<compile_context>
chip_gen: v5e
topology: v5e:2x2
jax: 0.10.0
libtpu: 0.0.40
codegen_flags: <defaults>
</compile_context>

<pallas_src>
import functools

import jax
import jax.numpy as jnp
from jax import lax
from jax.experimental import pallas as pl
from jax.experimental.pallas import tpu as pltpu


def _round_up(x, m):
    return (x + m - 1) // m * m


# ----------------------------------------------------------------------------
# Kernel 1: conv-as-im2col matmul (+bias) and per-tile BN partial statistics.
# ----------------------------------------------------------------------------
def conv_stats_kernel(patch_ref, w_ref, b_ref, y_ref, stats_ref, *, tm, m_total):
    i = pl.program_id(0)
    # MXU hot path: (TM, KP) x (KP, CP) -> f32 accumulate.
    y = jnp.dot(patch_ref[...], w_ref[...],
                preferred_element_type=jnp.float32) + b_ref[...]
    y_ref[...] = y

    # Partial BN stats for this tile. Mask rows beyond the true M so padded
    # rows (which evaluate to `bias`) do not enter the batch statistics.
    row = i * tm + lax.broadcasted_iota(jnp.int32, (tm, 1), 0)
    ym = jnp.where(row < m_total, y, 0.0)
    s = jnp.sum(ym, axis=0, keepdims=True)          # (1, CP)
    ss = jnp.sum(ym * ym, axis=0, keepdims=True)    # (1, CP)
    stats_ref[...] = jnp.concatenate([s, ss], axis=0)[None, :, :]   # (1, 2, CP)


# ----------------------------------------------------------------------------
# Kernel 2: BN affine (precomputed scale/shift) + LeakyReLU, lane-dense output.
# ----------------------------------------------------------------------------
def bn_lrelu_kernel(y_ref, scale_ref, shift_ref, o_ref, *, neg_slope):
    z = y_ref[...] * scale_ref[...] + shift_ref[...]
    o_ref[...] = jnp.where(z > 0, z, neg_slope * z)


# ----------------------------------------------------------------------------
# Glue: im2col + pallas_call wrapper
# ----------------------------------------------------------------------------
def _im2col_nchw(x_nchw, kh, kw, stride, padding):
    """Extract conv patches. Returns (N*OH*OW, KH*KW*Cin), OH, OW."""
    N, C, H, W = x_nchw.shape
    x = jnp.transpose(x_nchw, (0, 2, 3, 1))                              # NHWC
    x = jnp.pad(x, ((0, 0), (padding, padding), (padding, padding), (0, 0)))
    OH = (H + 2 * padding - kh) // stride + 1
    OW = (W + 2 * padding - kw) // stride + 1
    cols = []
    for i in range(kh):
        for j in range(kw):
            cols.append(x[:, i:i + stride * OH:stride, j:j + stride * OW:stride, :])
    patches = jnp.stack(cols, axis=3)                                    # (N,OH,OW,KH*KW,C)
    return patches.reshape(N * OH * OW, kh * kw * C), OH, OW


def unet_down_block(x_nchw, weight_oihw, bias, gamma, beta,
                    *, stride, padding, eps=1e-5, neg_slope=0.01,
                    compute_dtype=jnp.bfloat16):
    """x_nchw: (N, Cin, H, W)   weight_oihw: (Cout, Cin, KH, KW)."""
    N, Cin, H, W = x_nchw.shape
    Cout, _, KH, KW = weight_oihw.shape

    # TODO(synk): fuse im2col into the kernel (halo-tiled NHWC input DMA) to
    # avoid materializing the KH*KW-expanded patch matrix in HBM.
    patches, OH, OW = _im2col_nchw(x_nchw, KH, KW, stride, padding)      # (M, K)
    M, K = patches.shape

    in_bytes = jnp.dtype(compute_dtype).itemsize
    KP = _round_up(K, 128)                       # full-depth MXU contraction
    CP = _round_up(Cout, 128)                    # lane-dense outputs/stores
    TM = min(1024 if in_bytes <= 2 else 512, _round_up(M, 128))
    MP = _round_up(M, TM)
    GT = MP // TM

    # Weight: (Cout, Cin, KH, KW) -> (KH, KW, Cin, Cout) -> (K, Cout), matching
    # the patch column ordering; then zero-pad to (KP, CP).
    w2d = jnp.transpose(weight_oihw, (2, 3, 1, 0)).reshape(K, Cout)
    patches_p = jnp.pad(patches, ((0, MP - M), (0, KP - K))).astype(compute_dtype)
    w_p = jnp.pad(w2d, ((0, KP - K), (0, CP - Cout))).astype(compute_dtype)
    b_p = jnp.pad(bias.astype(jnp.float32), (0, CP - Cout)).reshape(1, CP)
    g_p = jnp.pad(gamma.astype(jnp.float32), (0, CP - Cout)).reshape(1, CP)
    be_p = jnp.pad(beta.astype(jnp.float32), (0, CP - Cout)).reshape(1, CP)

    # VMEM budget: 2x patch buffers + resident weights + 2x f32 output tiles.
    vmem_need = int(1.5 * (2 * TM * KP * in_bytes + KP * CP * in_bytes
                           + 2 * TM * CP * 4 + 8 * CP * 4)) + (1 << 20)
    vmem_limit = int(min(48 * 1024 * 1024, max(16 * 1024 * 1024, vmem_need)))
    cparams = pltpu.CompilerParams(dimension_semantics=("parallel",),
                                   vmem_limit_bytes=vmem_limit)

    # ---- Phase 1: conv matmul + partial stats -------------------------------
    k1 = functools.partial(conv_stats_kernel, tm=TM, m_total=M)
    y, part_stats = pl.pallas_call(
        k1,
        out_shape=(jax.ShapeDtypeStruct((MP, CP), jnp.float32),
                   jax.ShapeDtypeStruct((GT, 2, CP), jnp.float32)),
        grid=(GT,),
        in_specs=[
            pl.BlockSpec((TM, KP), lambda i: (i, 0)),
            pl.BlockSpec((KP, CP), lambda i: (0, 0)),
            pl.BlockSpec((1, CP), lambda i: (0, 0)),
        ],
        out_specs=(
            pl.BlockSpec((TM, CP), lambda i: (i, 0)),
            pl.BlockSpec((1, 2, CP), lambda i: (i, 0, 0)),
        ),
        compiler_params=cparams,
        cost_estimate=pl.CostEstimate(
            flops=2 * MP * KP * CP,
            transcendentals=0,
            bytes_accessed=(MP * KP * in_bytes + KP * CP * in_bytes
                            + MP * CP * 4 + GT * 2 * CP * 4)),
    )(patches_p, w_p, b_p)

    # ---- Global BN stats (training-mode, biased) over all N*OH*OW rows ------
    stats = jnp.sum(part_stats, axis=0)                     # (2, CP)
    mean = stats[0] / M
    var = jnp.maximum(stats[1] / M - mean * mean, 0.0)      # f32 accumulators
    inv_std = lax.rsqrt(var + eps)
    scale = (g_p[0] * inv_std).reshape(1, CP)
    shift = (be_p[0] - mean * g_p[0] * inv_std).reshape(1, CP)

    # ---- Phase 2: normalize + LeakyReLU -------------------------------------
    k2 = functools.partial(bn_lrelu_kernel, neg_slope=neg_slope)
    out_flat = pl.pallas_call(
        k2,
        out_shape=jax.ShapeDtypeStruct((MP, CP), jnp.float32),
        grid=(GT,),
        in_specs=[
            pl.BlockSpec((TM, CP), lambda i: (i, 0)),
            pl.BlockSpec((1, CP), lambda i: (0, 0)),
            pl.BlockSpec((1, CP), lambda i: (0, 0)),
        ],
        out_specs=pl.BlockSpec((TM, CP), lambda i: (i, 0)),
        compiler_params=cparams,
        cost_estimate=pl.CostEstimate(flops=4 * MP * CP, transcendentals=0,
                                      bytes_accessed=2 * MP * CP * 4),
    )(y, scale, shift)

    # (MP, CP) -> valid (M, Cout) -> (N, Cout, OH, OW)  (NCHW, matching PyTorch)
    out = out_flat[:M, :Cout].reshape(N, OH, OW, Cout)
    return jnp.transpose(out, (0, 3, 1, 2))


# ----------------------------------------------------------------------------
# Pure-JAX reference (for sanity check)
# ----------------------------------------------------------------------------
def reference(x, w, b, gamma, beta, *, stride, padding, eps=1e-5, neg_slope=0.01):
    y = lax.conv_general_dilated(
        x, w, window_strides=(stride, stride),
        padding=[(padding, padding), (padding, padding)],
        dimension_numbers=("NCHW", "OIHW", "NCHW"))
    y = y + b.reshape(1, -1, 1, 1)
    mean = jnp.mean(y, axis=(0, 2, 3), keepdims=True)
    var = jnp.mean((y - mean) ** 2, axis=(0, 2, 3), keepdims=True)
    y = (y - mean) * lax.rsqrt(var + eps)
    y = gamma.reshape(1, -1, 1, 1) * y + beta.reshape(1, -1, 1, 1)
    return jnp.where(y > 0, y, neg_slope * y)


if __name__ == "__main__":
    # Module config (UNetDownBlock passes kernel_size & stride; conv() padding default = 1)
    in_channels, out_channels = 4, 8
    kernel_size, stride, padding = 3, 2, 1
    N, H, W = 2, 16, 16

    key = jax.random.PRNGKey(0)
    kx, kw, kb = jax.random.split(key, 3)

    x = jax.random.normal(kx, (N, in_channels, H, W), dtype=jnp.float32)
    fan_in = in_channels * kernel_size * kernel_size
    weight = jax.random.normal(
        kw, (out_channels, in_channels, kernel_size, kernel_size),
        dtype=jnp.float32) * (1.0 / jnp.sqrt(fan_in))
    bias = jax.random.normal(kb, (out_channels,), dtype=jnp.float32) * 0.1
    gamma = jnp.ones((out_channels,), dtype=jnp.float32)   # BatchNorm2d weight init
    beta = jnp.zeros((out_channels,), dtype=jnp.float32)   # BatchNorm2d bias init

    ref = reference(x, weight, bias, gamma, beta, stride=stride, padding=padding)

    # f32 matmul path: tight correctness check against the reference.
    out_f32 = unet_down_block(x, weight, bias, gamma, beta,
                              stride=stride, padding=padding,
                              compute_dtype=jnp.float32)
    out_f32 = jax.block_until_ready(out_f32)
    assert out_f32.shape == ref.shape == (N, out_channels, H // stride, W // stride)
    assert jnp.allclose(out_f32, ref, atol=1e-3, rtol=1e-3), \
        float(jnp.max(jnp.abs(out_f32 - ref)))

    # bf16 matmul path (v6e/v7x MXU rate, halved HBM/VMEM traffic); epilogue f32.
    out_bf16 = unet_down_block(x, weight, bias, gamma, beta,
                               stride=stride, padding=padding,
                               compute_dtype=jnp.bfloat16)
    out_bf16 = jax.block_until_ready(out_bf16)
    assert out_bf16.shape == ref.shape
    assert jnp.allclose(out_bf16, ref, atol=6e-2, rtol=6e-2), \
        float(jnp.max(jnp.abs(out_bf16 - ref)))

    print("KERNEL_OK")
</pallas_src>

<mosaic_0001>
module attributes {stable_mosaic.version = 11 : i64} {
  func.func @conv_stats_kernel(%arg0: i32, %arg1: memref<128x128xf32, #tpu.memory_space<vmem>>, %arg2: memref<128x128xf32, #tpu.memory_space<vmem>>, %arg3: memref<1x128xf32, #tpu.memory_space<vmem>>, %arg4: memref<128x128xf32, #tpu.memory_space<vmem>>, %arg5: memref<1x2x128xf32, #tpu.memory_space<vmem>>) attributes {dimension_semantics = [#tpu.dimension_semantics<parallel>], iteration_bounds = array<i64: 1>, scalar_prefetch = 0 : i64, scratch_operands = 0 : i64, tpu.core_type = #tpu.core_type<tc>, window_params = [{transform_indices = @transform_0, window_bounds = array<i64: 128, 128>}, {pipeline_mode = #tpu.pipeline_mode<synchronous>, transform_indices = @transform_1, window_bounds = array<i64: 128, 128>}, {pipeline_mode = #tpu.pipeline_mode<synchronous>, transform_indices = @transform_2, window_bounds = array<i64: 1, 128>}, {transform_indices = @transform_3, window_bounds = array<i64: 128, 128>}, {transform_indices = @transform_4, window_bounds = array<i64: 1, 2, 128>}]} {
    %c0 = arith.constant 0 : index
    %c0_0 = arith.constant 0 : index
    %0 = vector.load %arg1[%c0, %c0_0] : memref<128x128xf32, #tpu.memory_space<vmem>>, vector<128x128xf32>
    %c0_1 = arith.constant 0 : index
    %c0_2 = arith.constant 0 : index
    %1 = vector.load %arg2[%c0_1, %c0_2] : memref<128x128xf32, #tpu.memory_space<vmem>>, vector<128x128xf32>
    %cst = arith.constant dense<0.000000e+00> : vector<128x128xf32>
    %2 = tpu.matmul %0, %1, %cst {dimension_numbers = #tpu.dot_dimension_numbers<[1], [0], [0], [1], [0, 0, 1, 1], [], []>} : vector<128x128xf32>, vector<128x128xf32>, vector<128x128xf32> -> vector<128x128xf32>
    %c0_3 = arith.constant 0 : index
    %c0_4 = arith.constant 0 : index
    %3 = vector.load %arg3[%c0_3, %c0_4] : memref<1x128xf32, #tpu.memory_space<vmem>>, vector<1x128xf32>
    %4 = vector.broadcast %3 : vector<1x128xf32> to vector<128x128xf32>
    %5 = arith.addf %2, %4 : vector<128x128xf32>
    %c0_5 = arith.constant 0 : index
    %c0_6 = arith.constant 0 : index
    %6 = vector.load %arg4[%c0_5, %c0_6] : memref<128x128xf32, #tpu.memory_space<vmem>>, vector<128x128xf32>
    tpu.vector_store %arg4[%c0_5, %c0_6], %5 {strides = array<i32>} : memref<128x128xf32, #tpu.memory_space<vmem>>, vector<128x128xf32>,
    %c128_i32 = arith.constant 128 : i32
    %7 = arith.muli %arg0, %c128_i32 : i32
    %8 = tpu.iota {dimensions = array<i32: 0>} : vector<128x1xi32>
    %9 = vector.broadcast %7 : i32 to vector<128x1xi32>
    %10 = arith.addi %9, %8 : vector<128x1xi32>
    %c128_i32_7 = arith.constant 128 : i32
    %11 = vector.broadcast %c128_i32_7 : i32 to vector<128x1xi32>
    %12 = arith.cmpi slt, %10, %11 : vector<128x1xi32>
    %cst_8 = arith.constant 0.000000e+00 : f32
    %13 = vector.shape_cast %12 : vector<128x1xi1> to vector<128x1xi1>
    %14 = vector.broadcast %13 : vector<128x1xi1> to vector<128x128xi1>
    %15 = vector.broadcast %cst_8 : f32 to vector<128x128xf32>
    %16 = arith.select %14, %5, %15 : vector<128x128xi1>, vector<128x128xf32>
    %cst_9 = arith.constant dense<0.000000e+00> : vector<128xf32>
    %17 = vector.multi_reduction <add>, %16, %cst_9 [0] : vector<128x128xf32> to vector<128xf32>
    %18 = vector.shape_cast %17 : vector<128xf32> to vector<1x128xf32>
    %19 = arith.mulf %16, %16 : vector<128x128xf32>
    %cst_10 = arith.constant dense<0.000000e+00> : vector<128xf32>
    %20 = vector.multi_reduction <add>, %19, %cst_10 [0] : vector<128x128xf32> to vector<128xf32>
    %21 = vector.shape_cast %20 : vector<128xf32> to vector<1x128xf32>
    %22 = tpu.concatenate %18, %21 in 0 : vector<1x128xf32>, vector<1x128xf32> -> vector<2x128xf32>
    %23 = vector.shape_cast %22 : vector<2x128xf32> to vector<1x2x128xf32>
    %c0_11 = arith.constant 0 : index
    %c0_12 = arith.constant 0 : index
    %c0_13 = arith.constant 0 : index
    %24 = vector.load %arg5[%c0_11, %c0_12, %c0_13] : memref<1x2x128xf32, #tpu.memory_space<vmem>>, vector<1x2x128xf32>
    tpu.vector_store %arg5[%c0_11, %c0_12, %c0_13], %23 {strides = array<i32>} : memref<1x2x128xf32, #tpu.memory_space<vmem>>, vector<1x2x128xf32>,
    return
  }
  func.func @transform_0(%arg0: i32) -> (i32, i32) {
    %c0_i32 = arith.constant 0 : i32
    %c0_i32_0 = arith.constant 0 : i32
    return %arg0, %c0_i32 : i32, i32
  }
  func.func @transform_1(%arg0: i32) -> (i32, i32) {
    %c0_i32 = arith.constant 0 : i32
    %c0_i32_0 = arith.constant 0 : i32
    %c0_i32_1 = arith.constant 0 : i32
    return %c0_i32, %c0_i32_0 : i32, i32
  }
  func.func @transform_2(%arg0: i32) -> (i32, i32) {
    %c0_i32 = arith.constant 0 : i32
    %c0_i32_0 = arith.constant 0 : i32
    %c0_i32_1 = arith.constant 0 : i32
    return %c0_i32, %c0_i32_0 : i32, i32
  }
  func.func @transform_3(%arg0: i32) -> (i32, i32) {
    %c0_i32 = arith.constant 0 : i32
    %c0_i32_0 = arith.constant 0 : i32
    return %arg0, %c0_i32 : i32, i32
  }
  func.func @transform_4(%arg0: i32) -> (i32, i32, i32) {
    %c0_i32 = arith.constant 0 : i32
    %c0_i32_0 = arith.constant 0 : i32
    %c0_i32_1 = arith.constant 0 : i32
    return %arg0, %c0_i32, %c0_i32_0 : i32, i32, i32
  }
}

</mosaic_0001>

<bundles_post_ra>
// kernel: tpu_custom_call.1
= control target key start
LH: loop header
LB: loop body
LE: loop exit
PB: predicated region body
PF: predicated region fallthrough
CT: control target
= control target key end

     0   :  { %10 = vsyncpa [#allocation3], 0  ;;  %s607_s0 = inlined_call_operand.hbm [shape: f32[128,128], index: 0, kind: input, shape index: {}]   ;;  %s608_s1 = inlined_call_operand.hbm [shape: f32[128,128], index: 1, kind: input, shape index: {}]   ;;  %s609_s2 = inlined_call_operand.vmem [shape: f32[1,128], index: 2, kind: input, shape index: {}]   ;;  %s610_s3 = inlined_call_operand.hbm [shape: f32[128,128], index: 3, kind: output, shape index: {0}]   ;;  %s611_s4 = inlined_call_operand.hbm [shape: f32[1,2,128], index: 4, kind: output, shape index: {1}]  }
   0x1   :  { %11 = vsyncpa [#allocation6], 0 }
   0x2   :  { %12 = vsyncpa [#allocation4], 0 }
   0x3   :  { %13 = vsyncpa [#allocation9], 0  ;;  %s18_s17 = sshll.u32 %s607_s0, 4  ;;  %s522_s18 = smov [#allocation2]   ;;  %s19_s17 = int_to_ptr.hbm [resolvable:$true] %s18_s17 }
   0x4   :  { %s20_s19 = sshll.u32 %s522_s18, 4  ;;  %s31_s22 = sshll.u32 %s608_s1, 4  ;;  %s21_s19 = int_to_ptr.vmem [resolvable:$true] %s20_s19  ;;  %s32_s22 = int_to_ptr.hbm [resolvable:$true] %s31_s22 }
   0x5   :  { %s523_s23 = smov 128   ;;  %s524_s24 = smov 8  }
   0x6   :  { %26 = dma.hbm_to_vmem [thread:$0]  %s19_s17, 2048, %s21_s19, [#allocation3], %s523_s23, %s523_s23, %s524_s24  }
   0x7   :  { %s525_s25 = smov [#allocation5]  }
   0x8   :  { %s33_s26 = sshll.u32 %s525_s25, 4  ;;  %s34_s26 = int_to_ptr.vmem [resolvable:$true] %s33_s26 }
   0x9   :  { %39 = dma.hbm_to_vmem [thread:$0]  %s32_s22, 2048, %s34_s26, [#allocation6], %s523_s23, %s523_s23, %s524_s24  }
   0xa   :  { %514 = dma.done.wait [#allocation3], 2048  }
   0xb   :  { %515 = vsyncadd [#allocation3], 4294965248 }
   0xc   :  { %516 = dma.done.wait [#allocation6], 2048  }
   0xd   :  { %517 = vsyncadd [#allocation6], 4294965248  ;;  %v81_v0 = vld [vmem:[#allocation5 + $0x78] sm:$0xff]  ;;  %v80_v1 = vld [vmem:[#allocation5 + $0x70] sm:$0xff]  ;;  %s333_s30 = sshll.u32 %s610_s3, 4  ;;  %s527_s3 = smov [#allocation8]   ;;  %s334_s30 = int_to_ptr.hbm [resolvable:$true] %s333_s30 }
   0xe   :  { %86 = vmatpush.msra.mxu0 %v81_v0  ;;  %363 = vmatpush.msra.mxu1 %v81_v0  ;;  %v79_v2 = vld [vmem:[#allocation5 + $0x68] sm:$0xff]  ;;  %v78_v3 = vld [vmem:[#allocation5 + $0x60] sm:$0xff]  ;;  %v77_v4 = vld [vmem:[#allocation5 + $0x58] sm:$0xff]  ;;  %s345_s5 = sshll.u32 %s527_s3, 4  ;;  %s347_s8 = sshll.u32 %s611_s4, 4  ;;  %vm324_vm0 = vcmask 1040384   ;;  %s346_s5 = int_to_ptr.vmem [resolvable:$true] %s345_s5  ;;  %s348_s8 = int_to_ptr.hbm [resolvable:$true] %s347_s8 }
   0xf   :  { %364 = vmatpush.msra.mxu2 %v81_v0  ;;  %365 = vmatpush.msra.mxu3 %v81_v0  ;;  %v76_v5 = vld [vmem:[#allocation5 + $0x50] sm:$0xff]  ;;  %v75_v6 = vld [vmem:[#allocation5 + $0x48] sm:$0xff]  ;;  %v74_v7 = vld [vmem:[#allocation5 + $0x40] sm:$0xff] }
  0x10   :  { %87 = vmatpush.msra.mxu0 %v80_v1  ;;  %366 = vmatpush.msra.mxu1 %v80_v1  ;;  %v73_v8 = vld [vmem:[#allocation5 + $0x38] sm:$0xff]  ;;  %v72_v9 = vld [vmem:[#allocation5 + $0x30] sm:$0xff]  ;;  %v71_v10 = vld [vmem:[#allocation5 + $0x28] sm:$0xff] }
  0x11   :  { %367 = vmatpush.msra.mxu2 %v80_v1  ;;  %368 = vmatpush.msra.mxu3 %v80_v1  ;;  %v70_v11 = vld [vmem:[#allocation5 + $0x20] sm:$0xff]  ;;  %v69_v12 = vld [vmem:[#allocation5 + $0x18] sm:$0xff]  ;;  %v68_v13 = vld [vmem:[#allocation5 + $0x10] sm:$0xff] }
  0x12   :  { %88 = vmatpush.msra.mxu0 %v79_v2  ;;  %369 = vmatpush.msra.mxu1 %v79_v2  ;;  %v67_v14 = vld [vmem:[#allocation5 + $0x8] sm:$0xff]  ;;  %v66_v15 = vld [vmem:[#allocation5] sm:$0xff]  ;;  %v52_v24 = vld [vmem:[#allocation2 + $0x10] sm:$0xff] }
  0x13   :  { %370 = vmatpush.msra.mxu2 %v79_v2  ;;  %371 = vmatpush.msra.mxu3 %v79_v2  ;;  %v50_v16 = vld [vmem:[#allocation2] sm:$0xff]  ;;  %v51_v20 = vld [vmem:[#allocation2 + $0x8] sm:$0xff]  ;;  %v56_v25 = vld [vmem:[#allocation2 + $0x30] sm:$0xff] }
  0x14   :  { %89 = vmatpush.msra.mxu0 %v78_v3  ;;  %372 = vmatpush.msra.mxu1 %v78_v3  ;;  %v54_v17 = vld [vmem:[#allocation2 + $0x20] sm:$0xff]  ;;  %v55_v21 = vld [vmem:[#allocation2 + $0x28] sm:$0xff]  ;;  %v60_v26 = vld [vmem:[#allocation2 + $0x50] sm:$0xff] }
  0x15   :  { %373 = vmatpush.msra.mxu2 %v78_v3  ;;  %374 = vmatpush.msra.mxu3 %v78_v3  ;;  %v58_v18 = vld [vmem:[#allocation2 + $0x40] sm:$0xff]  ;;  %v59_v22 = vld [vmem:[#allocation2 + $0x48] sm:$0xff]  ;;  %v64_v27 = vld [vmem:[#allocation2 + $0x70] sm:$0xff] }
  0x16   :  { %90 = vmatpush.msra.mxu0 %v77_v4  ;;  %375 = vmatpush.msra.mxu1 %v77_v4  ;;  %v62_v19 = vld [vmem:[#allocation2 + $0x60] sm:$0xff]  ;;  %v63_v23 = vld [vmem:[#allocation2 + $0x68] sm:$0xff]  ;;  %v53_v28 = vld [vmem:[#allocation2 + $0x18] sm:$0xff] }
  0x17   :  { %376 = vmatpush.msra.mxu2 %v77_v4  ;;  %377 = vmatpush.msra.mxu3 %v77_v4  ;;  %v57_v29 = vld [vmem:[#allocation2 + $0x38] sm:$0xff]  ;;  %v568_v32 = vld [vmem:[%s609_s2] ss:$0 sm:$0xff]  ;;  %s526_s2 = smov [#allocation7]  }
  0x18   :  { %91 = vmatpush.msra.mxu0 %v76_v5  ;;  %378 = vmatpush.msra.mxu1 %v76_v5  ;;  %v61_v30 = vld [vmem:[#allocation2 + $0x58] sm:$0xff]  ;;  %s331_s27 = sshll.u32 %s526_s2, 4  ;;  %s332_s27 = int_to_ptr.vmem [resolvable:$true] %s331_s27 }
  0x19   :  { %379 = vmatpush.msra.mxu2 %v76_v5  ;;  %380 = vmatpush.msra.mxu3 %v76_v5  ;;  %v65_v31 = vld [vmem:[#allocation2 + $0x78] sm:$0xff] }
  0x1a   :  { %92 = vmatpush.msra.mxu0 %v75_v6  ;;  %381 = vmatpush.msra.mxu1 %v75_v6 }
  0x1b   :  { %382 = vmatpush.msra.mxu2 %v75_v6  ;;  %383 = vmatpush.msra.mxu3 %v75_v6 }
  0x1c   :  { %93 = vmatpush.msra.mxu0 %v74_v7  ;;  %384 = vmatpush.msra.mxu1 %v74_v7 }
  0x1d   :  { %385 = vmatpush.msra.mxu2 %v74_v7  ;;  %386 = vmatpush.msra.mxu3 %v74_v7 }
  0x1e   :  { %94 = vmatpush.msra.mxu0 %v73_v8  ;;  %387 = vmatpush.msra.mxu1 %v73_v8 }
  0x1f   :  { %388 = vmatpush.msra.mxu2 %v73_v8  ;;  %389 = vmatpush.msra.mxu3 %v73_v8 }
  0x20   :  { %95 = vmatpush.msra.mxu0 %v72_v9  ;;  %390 = vmatpush.msra.mxu1 %v72_v9 }
  0x21   :  { %391 = vmatpush.msra.mxu2 %v72_v9  ;;  %392 = vmatpush.msra.mxu3 %v72_v9 }
  0x22   :  { %96 = vmatpush.msra.mxu0 %v71_v10  ;;  %393 = vmatpush.msra.mxu1 %v71_v10 }
  0x23   :  { %394 = vmatpush.msra.mxu2 %v71_v10  ;;  %395 = vmatpush.msra.mxu3 %v71_v10 }
  0x24   :  { %97 = vmatpush.msra.mxu0 %v70_v11  ;;  %396 = vmatpush.msra.mxu1 %v70_v11 }
  0x25   :  { %397 = vmatpush.msra.mxu2 %v70_v11  ;;  %398 = vmatpush.msra.mxu3 %v70_v11 }
  0x26   :  { %98 = vmatpush.msra.mxu0 %v69_v12  ;;  %399 = vmatpush.msra.mxu1 %v69_v12 }
  0x27   :  { %400 = vmatpush.msra.mxu2 %v69_v12  ;;  %401 = vmatpush.msra.mxu3 %v69_v12 }
  0x28   :  { %99 = vmatpush.msra.mxu0 %v68_v13  ;;  %402 = vmatpush.msra.mxu1 %v68_v13 }
  0x29   :  { %403 = vmatpush.msra.mxu2 %v68_v13  ;;  %404 = vmatpush.msra.mxu3 %v68_v13 }
  0x2a   :  { %100 = vmatpush.msra.mxu0 %v67_v14  ;;  %405 = vmatpush.msra.mxu1 %v67_v14 }
  0x2b   :  { %406 = vmatpush.msra.mxu2 %v67_v14  ;;  %407 = vmatpush.msra.mxu3 %v67_v14 }
  0x2c   :  { %101 = vmatpush.msra.mxu0 %v66_v15  ;;  %408 = vmatpush.msra.mxu1 %v66_v15 }
  0x2d   :  { %102 = vmatmul.f32.vlgmr.msra.gmra.mxu0 %v50_v16  ;;  %114 = vmatmul.f32.vlgmr.msra.gmra.mxu1 %v54_v17 }
  0x2e   :  { %409 = vmatpush.msra.mxu2 %v66_v15  ;;  %410 = vmatpush.msra.mxu3 %v66_v15 }
  0x2f   :  { %126 = vmatmul.f32.vlgmr.msra.gmra.mxu2 %v58_v18  ;;  %138 = vmatmul.f32.vlgmr.msra.gmra.mxu3 %v62_v19 }
  0x35   :  { %105 = vmatmul.f32.gmra.mxu0 %v51_v20  ;;  %117 = vmatmul.f32.gmra.mxu1 %v55_v21 }
  0x37   :  { %129 = vmatmul.f32.gmra.mxu2 %v59_v22  ;;  %141 = vmatmul.f32.gmra.mxu3 %v63_v23 }
  0x3d   :  { %108 = vmatmul.f32.gmra.mxu0 %v52_v24  ;;  %120 = vmatmul.f32.gmra.mxu1 %v56_v25 }
  0x3f   :  { %132 = vmatmul.f32.gmra.mxu2 %v60_v26  ;;  %144 = vmatmul.f32.gmra.mxu3 %v64_v27 }
  0x45   :  { %111 = vmatmul.f32.gmra.mxu0 %v53_v28  ;;  %123 = vmatmul.f32.gmra.mxu1 %v57_v29 }
  0x47   :  { %135 = vmatmul.f32.gmra.mxu2 %v61_v30  ;;  %147 = vmatmul.f32.gmra.mxu3 %v65_v31 }
  0xaa   :  { %v103_v33 = vpop.f32.mrf.mxu0  ;;  %v115_v34 = vpop.f32.mrf.mxu1 }
  0xab   :  { %v104_v35 = vadd.f32 %v568_v32, %v103_v33  ;;  %v116_v36 = vadd.f32 %v568_v32, %v115_v34 }
  0xad   :  { %151 = vst [vmem:[#allocation7] sm:$0xff] %v104_v35  ;;  %v287_v54 = vmul.f32 %v104_v35, %v104_v35  ;;  %v291_v6 = vmul.f32 %v116_v36, %v116_v36 }
  0xae   :  { %155 = vst [vmem:[#allocation7 + $0x20] sm:$0xff] %v116_v36 }
  0xb2   :  { %v106_v37 = vpop.f32.mrf.mxu0  ;;  %v118_v38 = vpop.f32.mrf.mxu1 }
  0xb3   :  { %v107_v39 = vadd.f32 %v568_v32, %v106_v37  ;;  %v119_v40 = vadd.f32 %v568_v32, %v118_v38  ;;  %v127_v41 = vpop.f32.mrf.mxu2  ;;  %v139_v42 = vpop.f32.mrf.mxu3 }
  0xb4   :  { %v128_v43 = vadd.f32 %v568_v32, %v127_v41  ;;  %v576_v44 = vadd.f32 %v568_v32, %v139_v42 }
  0xb5   :  { %152 = vst [vmem:[#allocation7 + $0x8] sm:$0xff] %v107_v39  ;;  %v288_v53 = vmul.f32 %v107_v39, %v107_v39  ;;  %v266_v55 = vadd.f32 %v107_v39, %v104_v35  ;;  %v292_v9 = vmul.f32 %v119_v40, %v119_v40 }
  0xb6   :  { %156 = vst [vmem:[#allocation7 + $0x28] sm:$0xff] %v119_v40  ;;  %v295_v22 = vmul.f32 %v128_v43, %v128_v43  ;;  %v299_v34 = vmul.f32 %v576_v44, %v576_v44 }
  0xb7   :  { %159 = vst [vmem:[#allocation7 + $0x40] sm:$0xff] %v128_v43  ;;  %v303_v59 = vadd.f32 %v288_v53, %v287_v54 }
  0xb8   :  { %163 = vst [vmem:[#allocation7 + $0x60] sm:$0xff] %v576_v44 }
  0xba   :  { %v109_v45 = vpop.f32.mrf.mxu0  ;;  %v121_v46 = vpop.f32.mrf.mxu1 }
  0xbb   :  { %v110_v47 = vadd.f32 %v568_v32, %v109_v45  ;;  %v122_v48 = vadd.f32 %v568_v32, %v121_v46  ;;  %v130_v49 = vpop.f32.mrf.mxu2  ;;  %v142_v50 = vpop.f32.mrf.mxu3 }
  0xbc   :  { %v131_v51 = vadd.f32 %v568_v32, %v130_v49  ;;  %v583_v52 = vadd.f32 %v568_v32, %v142_v50 }
  0xbd   :  { %153 = vst [vmem:[#allocation7 + $0x10] sm:$0xff] %v110_v47  ;;  %v289_v56 = vmul.f32 %v110_v47, %v110_v47  ;;  %v267_v60 = vadd.f32 %v266_v55, %v110_v47  ;;  %v293_v13 = vmul.f32 %v122_v48, %v122_v48 }
  0xbe   :  { %157 = vst [vmem:[#allocation7 + $0x30] sm:$0xff] %v122_v48  ;;  %v296_v25 = vmul.f32 %v131_v51, %v131_v51  ;;  %v300_v37 = vmul.f32 %v583_v52, %v583_v52 }
  0xbf   :  { %160 = vst [vmem:[#allocation7 + $0x48] sm:$0xff] %v131_v51  ;;  %v304_v3 = vadd.f32 %v303_v59, %v289_v56 }
  0xc0   :  { %164 = vst [vmem:[#allocation7 + $0x68] sm:$0xff] %v583_v52 }
  0xc2   :  { %v112_v57 = vpop.f32.mrf.mxu0  ;;  %v124_v58 = vpop.f32.mrf.mxu1 }
  0xc3   :  { %v113_v61 = vadd.f32 %v568_v32, %v112_v57  ;;  %v125_v62 = vadd.f32 %v568_v32, %v124_v58  ;;  %v133_v63 = vpop.f32.mrf.mxu2  ;;  %v145_v0 = vpop.f32.mrf.mxu3 }
  0xc4   :  { %v134_v1 = vadd.f32 %v568_v32, %v133_v63  ;;  %v146_v2 = vadd.f32 %v568_v32, %v145_v0 }
  0xc5   :  { %154 = vst [vmem:[#allocation7 + $0x18] sm:$0xff] %v113_v61  ;;  %v268_v4 = vadd.f32 %v267_v60, %v113_v61  ;;  %v290_v5 = vmul.f32 %v113_v61, %v113_v61  ;;  %v294_v15 = vmul.f32 %v125_v62, %v125_v62 }
  0xc6   :  { %158 = vst [vmem:[#allocation7 + $0x38] sm:$0xff] %v125_v62  ;;  %v297_v29 = vmul.f32 %v134_v1, %v134_v1  ;;  %v301_v41 = vmul.f32 %v146_v2, %v146_v2 }
  0xc7   :  { %v269_v7 = vadd.f32 %v268_v4, %v116_v36  ;;  %v305_v8 = vadd.f32 %v304_v3, %v290_v5  ;;  %161 = vst [vmem:[#allocation7 + $0x50] sm:$0xff] %v134_v1 }
  0xc8   :  { %165 = vst [vmem:[#allocation7 + $0x70] sm:$0xff] %v146_v2 }
  0xc9   :  { %v306_v10 = vadd.f32 %v305_v8, %v291_v6  ;;  %v270_v11 = vadd.f32 %v269_v7, %v119_v40 }
  0xcb   :  { %v271_v12 = vadd.f32 %v270_v11, %v122_v48  ;;  %v307_v14 = vadd.f32 %v306_v10, %v292_v9  ;;  %v136_v16 = vpop.f32.mrf.mxu2  ;;  %v148_v17 = vpop.f32.mrf.mxu3 }
  0xcc   :  { %v137_v18 = vadd.f32 %v568_v32, %v136_v16  ;;  %v149_v19 = vadd.f32 %v568_v32, %v148_v17 }
  0xcd   :  { %v308_v20 = vadd.f32 %v307_v14, %v293_v13  ;;  %v272_v21 = vadd.f32 %v271_v12, %v125_v62 }
  0xce   :  { %162 = vst [vmem:[#allocation7 + $0x58] sm:$0xff] %v137_v18  ;;  %v298_v31 = vmul.f32 %v137_v18, %v137_v18 }
  0xcf   :  { %v273_v23 = vadd.f32 %v272_v21, %v128_v43  ;;  %v309_v24 = vadd.f32 %v308_v20, %v294_v15  ;;  %166 = vst [vmem:[#allocation7 + $0x78] sm:$0xff] %v149_v19  ;;  %v302_v43 = vmul.f32 %v149_v19, %v149_v19 }
  0xd0   :  { %339 = dma.vmem_to_hbm [thread:$0]  %s332_s27, 2048, %s334_s30, [#allocation4], %s523_s23, %s523_s23, %s524_s24  }
  0xd1   :  { %v310_v26 = vadd.f32 %v309_v24, %v295_v22  ;;  %v274_v27 = vadd.f32 %v273_v23, %v131_v51 }
  0xd3   :  { %v275_v28 = vadd.f32 %v274_v27, %v134_v1  ;;  %v311_v30 = vadd.f32 %v310_v26, %v296_v25 }
  0xd5   :  { %v312_v32 = vadd.f32 %v311_v30, %v297_v29  ;;  %v276_v33 = vadd.f32 %v275_v28, %v137_v18 }
  0xd7   :  { %v277_v35 = vadd.f32 %v276_v33, %v576_v44  ;;  %v313_v36 = vadd.f32 %v312_v32, %v298_v31 }
  0xd9   :  { %v314_v38 = vadd.f32 %v313_v36, %v299_v34  ;;  %v278_v39 = vadd.f32 %v277_v35, %v583_v52 }
  0xdb   :  { %v279_v40 = vadd.f32 %v278_v39, %v146_v2  ;;  %v315_v42 = vadd.f32 %v314_v38, %v300_v37 }
  0xdd   :  { %v316_v45 = vadd.f32 %v315_v42, %v301_v41  ;;  %v280_v46 = vadd.f32 %v279_v40, %v149_v19 }
  0xdf   :  { %v281_v47 = vrot.slane %v280_v46, 4  ;;  %v317_v48 = vadd.f32 %v316_v45, %v302_v43 }
  0xe1   :  { %v282_v49 = vadd.f32 %v281_v47, %v280_v46  ;;  %v318_v50 = vrot.slane %v317_v48, 4 }
  0xe3   :  { %v283_v51 = vrot.slane %v282_v49, 2  ;;  %v319_v53 = vadd.f32 %v318_v50, %v317_v48 }
  0xe5   :  { %v284_v44 = vadd.f32 %v283_v51, %v282_v49  ;;  %v320_v54 = vrot.slane %v319_v53, 2 }
  0xe7   :  { %v285_v55 = vrot.slane %v284_v44, 1  ;;  %v321_v56 = vadd.f32 %v320_v54, %v319_v53 }
  0xe9   :  { %v322_v57 = vrot.slane %v321_v56, 1  ;;  %v286_v52 = vadd.f32 %v285_v55, %v284_v44 }
  0xeb   :  { %v323_v58 = vadd.f32 %v322_v57, %v321_v56 }
  0xed   :  { %v325_v59 = vsel %vm324_vm0, %v286_v52, %v323_v58 }
  0xee   :  { %326 = vst [vmem:[#allocation8] sm:$0x3] %v325_v59 }
  0xef   :  { %350 = dma.vmem_to_hbm [thread:$0]  %s346_s5, 32, %s348_s8, [#allocation9]  }
  0xf0   :  { %518 = dma.done.wait [#allocation4], 2048  }
  0xf1   :  { %519 = vsyncadd [#allocation4], 4294965248 }
  0xf2   :  { %520 = dma.done.wait [#allocation9], 32  }
  0xf3   :  { %521 = vsyncadd [#allocation9], 4294967264 }
  0xf4   :  { %359 = vsyncpa [#allocation3], 1 }
  0xf5   :  { %360 = vsyncpa [#allocation6], 1 }
  0xf6   :  { %361 = vsyncpa [#allocation4], 1 }
  0xf7   :  { %362 = vsyncpa [#allocation9], 1 }

</bundles_post_ra>
